<compile_context>
chip_gen: v7x
topology: tpu7x:2x2x1
jax: 0.10.0
libtpu: 0.0.40
codegen_flags: <defaults>
</compile_context>

<pallas_src>
import jax
import jax.numpy as jnp
from jax.experimental import pallas as pl
from jax.experimental.pallas import tpu as pltpu


# ----------------------------- config --------------------------------------
N_USERS   = 32
N_ITEMS   = 40
N_FACTORS = 8                  # GMF embedding dim
LAYERS    = [32, 16, 8]        # MLP: 32 -> 16 -> 8 ; mlp emb dim = 32 // 2 = 16
MLP_EMB   = LAYERS[0] // 2
EMB_ROWS  = N_FACTORS + MLP_EMB   # stacked (gmf ; mlp) table rows = 24
BATCH     = 16
MAX_TB    = 4096               # lanes per grid step (multiple of 128); sweepable.
                               # For very large B on v7x keep grid >= 2 so both TCs work.


# ----------------------------- kernel --------------------------------------
def ncf_kernel(uid_ref, iid_ref, user_tab_ref, item_tab_ref,
               w1u_ref, w1i_ref, b1_ref, w2_ref, b2_ref,
               wpg_ref, wpm_ref, pb_ref, out_ref):
    tb = uid_ref.shape[1]

    # In-kernel embedding "gather": one-hot (rows == id) matmul against the stacked
    # [gmf ; mlp] tables.  Tables are (24, n_users/n_items) and fully VMEM-resident.
    onehot_u = (jax.lax.broadcasted_iota(jnp.int32, (N_USERS, tb), 0)
                == uid_ref[...]).astype(jnp.float32)                     # (n_users, TB)
    onehot_i = (jax.lax.broadcasted_iota(jnp.int32, (N_ITEMS, tb), 0)
                == iid_ref[...]).astype(jnp.float32)                     # (n_items, TB)

    u_all = jnp.dot(user_tab_ref[...], onehot_u,
                    preferred_element_type=jnp.float32)                  # (24, TB)
    i_all = jnp.dot(item_tab_ref[...], onehot_i,
                    preferred_element_type=jnp.float32)                  # (24, TB)

    u_gmf, u_mlp = u_all[:N_FACTORS, :], u_all[N_FACTORS:, :]            # (8,TB),(16,TB)
    i_gmf, i_mlp = i_all[:N_FACTORS, :], i_all[N_FACTORS:, :]

    # GMF branch: elementwise product (VPU), lane-dense (8, TB) tile.
    gmf = u_gmf * i_gmf

    # MLP branch, transposed: h^T = w1^T @ x^T with x = concat(u, i) split into two
    # K=16 dots (no concat anywhere).
    h = (jnp.dot(w1u_ref[...], u_mlp, preferred_element_type=jnp.float32)
         + jnp.dot(w1i_ref[...], i_mlp, preferred_element_type=jnp.float32)
         + b1_ref[...])
    h = jnp.maximum(h, 0.0)                                              # (16, TB)

    h = jnp.dot(w2_ref[...], h, preferred_element_type=jnp.float32) + b2_ref[...]
    h = jnp.maximum(h, 0.0)                                              # (8, TB)

    # Final N=1 projection on the VPU + sublane (XLU) reduction:
    #   concat(gmf, h) @ pred_w + pred_b == sum(gmf*wp[:F] + h*wp[F:], axis=features)
    r = jnp.sum(gmf * wpg_ref[...] + h * wpm_ref[...], axis=0, keepdims=True)
    out_ref[...] = r + pb_ref[0, 0]                                      # (1, TB) lane-dense


# ----------------------------- wrapper --------------------------------------
def ncf_forward(params, U_ids, I_ids):
    B = U_ids.shape[0]
    if B <= MAX_TB:
        TB, B_pad = B, B                       # single step, full-array blocks
    else:
        TB = MAX_TB                            # multiple of 128 -> lane-aligned blocks
        B_pad = pl.cdiv(B, TB) * TB            # pad ragged last tile instead of asserting

    uid = U_ids.astype(jnp.int32)
    iid = I_ids.astype(jnp.int32)
    if B_pad != B:
        uid = jnp.pad(uid, (0, B_pad - B))
        iid = jnp.pad(iid, (0, B_pad - B))
    uid = uid.reshape(1, B_pad)
    iid = iid.reshape(1, B_pad)

    # Parameter plumbing (tiny, batch-independent): stacked transposed tables,
    # transposed weights, column biases, pre-split pred_w.
    user_tab = jnp.concatenate(
        [params["gmf_user_emb"], params["mlp_user_emb"]], axis=1).T      # (24, n_users)
    item_tab = jnp.concatenate(
        [params["gmf_item_emb"], params["mlp_item_emb"]], axis=1).T      # (24, n_items)
    w1uT = params["mlp_w1"][:MLP_EMB, :].T                               # (16, 16)
    w1iT = params["mlp_w1"][MLP_EMB:, :].T                               # (16, 16)
    b1c  = params["mlp_b1"].reshape(LAYERS[1], 1)                        # (16, 1)
    w2T  = params["mlp_w2"].T                                            # (8, 16)
    b2c  = params["mlp_b2"].reshape(LAYERS[2], 1)                        # (8, 1)
    wpg  = params["pred_w"][:N_FACTORS, :]                               # (8, 1)
    wpm  = params["pred_w"][N_FACTORS:, :]                               # (8, 1)
    pb   = params["pred_b"].reshape(1, 1)                                # (1, 1) -> SMEM

    grid = (B_pad // TB,)
    id_spec = pl.BlockSpec((1, TB), lambda i: (0, i))
    const = lambda r, c: pl.BlockSpec((r, c), lambda i: (0, 0))

    out = pl.pallas_call(
        ncf_kernel,
        out_shape=jax.ShapeDtypeStruct((1, B_pad), jnp.float32),
        grid_spec=pltpu.PrefetchScalarGridSpec(
            num_scalar_prefetch=0,
            grid=grid,
            in_specs=[
                id_spec,                                 # uid  (1, TB) int32
                id_spec,                                 # iid  (1, TB) int32
                const(EMB_ROWS, N_USERS),                # stacked user table^T
                const(EMB_ROWS, N_ITEMS),                # stacked item table^T
                const(LAYERS[1], MLP_EMB),               # w1[:16]^T
                const(LAYERS[1], MLP_EMB),               # w1[16:]^T
                const(LAYERS[1], 1),                     # b1 column
                const(LAYERS[2], LAYERS[1]),             # w2^T
                const(LAYERS[2], 1),                     # b2 column
                const(N_FACTORS, 1),                     # pred_w[:F]
                const(LAYERS[2], 1),                     # pred_w[F:]
                pl.BlockSpec(memory_space=pltpu.MemorySpace.SMEM),   # pred_b scalar
            ],
            out_specs=pl.BlockSpec((1, TB), lambda i: (0, i)),
        ),
        compiler_params=pltpu.CompilerParams(
            dimension_semantics=("parallel",)),
    )(uid, iid, user_tab, item_tab, w1uT, w1iT, b1c, w2T, b2c, wpg, wpm, pb)

    return out.reshape(-1)[:B]                                           # .view(-1)


# ------------------------- reference (pure JAX) ------------------------------
def ncf_reference(params, U_ids, I_ids):
    u_gmf = params["gmf_user_emb"][U_ids]
    i_gmf = params["gmf_item_emb"][I_ids]
    u_mlp = params["mlp_user_emb"][U_ids]
    i_mlp = params["mlp_item_emb"][I_ids]

    gmf = u_gmf * i_gmf
    x = jnp.concatenate([u_mlp, i_mlp], axis=-1)
    h = jnp.maximum(x @ params["mlp_w1"] + params["mlp_b1"], 0.0)
    h = jnp.maximum(h @ params["mlp_w2"] + params["mlp_b2"], 0.0)
    logits = jnp.concatenate([gmf, h], axis=-1)
    return (logits @ params["pred_w"] + params["pred_b"]).reshape(-1)


# ----------------------------- main ------------------------------------------
if __name__ == "__main__":
    key = jax.random.PRNGKey(0)
    ks = jax.random.split(key, 12)

    params = {
        "gmf_user_emb": jax.random.normal(ks[0], (N_USERS, N_FACTORS), jnp.float32) * 0.1,
        "gmf_item_emb": jax.random.normal(ks[1], (N_ITEMS, N_FACTORS), jnp.float32) * 0.1,
        "mlp_user_emb": jax.random.normal(ks[2], (N_USERS, MLP_EMB), jnp.float32) * 0.1,
        "mlp_item_emb": jax.random.normal(ks[3], (N_ITEMS, MLP_EMB), jnp.float32) * 0.1,
        "mlp_w1": jax.random.normal(ks[4], (LAYERS[0], LAYERS[1]), jnp.float32) * 0.1,
        "mlp_b1": jax.random.normal(ks[5], (1, LAYERS[1]), jnp.float32) * 0.1,
        "mlp_w2": jax.random.normal(ks[6], (LAYERS[1], LAYERS[2]), jnp.float32) * 0.1,
        "mlp_b2": jax.random.normal(ks[7], (1, LAYERS[2]), jnp.float32) * 0.1,
        "pred_w": jax.random.normal(ks[8], (N_FACTORS + LAYERS[-1], 1), jnp.float32) * 0.1,
        "pred_b": jax.random.normal(ks[9], (1, 1), jnp.float32) * 0.1,
    }

    U_ids = jax.random.randint(ks[10], (BATCH,), 0, N_USERS, dtype=jnp.int32)
    I_ids = jax.random.randint(ks[11], (BATCH,), 0, N_ITEMS, dtype=jnp.int32)

    out = jax.block_until_ready(ncf_forward(params, U_ids, I_ids))
    ref = jax.block_until_ready(ncf_reference(params, U_ids, I_ids))

    assert out.shape == (BATCH,)
    assert jnp.allclose(out, ref, atol=1e-5, rtol=1e-5)
    print("KERNEL_OK")
</pallas_src>

<mosaic_0001>
module attributes {stable_mosaic.version = 11 : i64} {
  func.func @ncf_kernel(%arg0: i32, %arg1: memref<1x16xi32, #tpu.memory_space<vmem>>, %arg2: memref<1x16xi32, #tpu.memory_space<vmem>>, %arg3: memref<24x32xf32, #tpu.memory_space<vmem>>, %arg4: memref<24x40xf32, #tpu.memory_space<vmem>>, %arg5: memref<16x16xf32, #tpu.memory_space<vmem>>, %arg6: memref<16x16xf32, #tpu.memory_space<vmem>>, %arg7: memref<16x1xf32, #tpu.memory_space<vmem>>, %arg8: memref<8x16xf32, #tpu.memory_space<vmem>>, %arg9: memref<8x1xf32, #tpu.memory_space<vmem>>, %arg10: memref<8x1xf32, #tpu.memory_space<vmem>>, %arg11: memref<8x1xf32, #tpu.memory_space<vmem>>, %arg12: memref<1x1xf32, #tpu.memory_space<smem>>, %arg13: memref<1x16xf32, #tpu.memory_space<vmem>>) attributes {dimension_semantics = [#tpu.dimension_semantics<parallel>], iteration_bounds = array<i64: 1>, scalar_prefetch = 0 : i64, scratch_operands = 0 : i64, tpu.core_type = #tpu.core_type<tc>, window_params = [{transform_indices = @transform_0, window_bounds = array<i64: 1, 16>}, {transform_indices = @transform_1, window_bounds = array<i64: 1, 16>}, {pipeline_mode = #tpu.pipeline_mode<synchronous>, transform_indices = @transform_2, window_bounds = array<i64: 24, 32>}, {pipeline_mode = #tpu.pipeline_mode<synchronous>, transform_indices = @transform_3, window_bounds = array<i64: 24, 40>}, {pipeline_mode = #tpu.pipeline_mode<synchronous>, transform_indices = @transform_4, window_bounds = array<i64: 16, 16>}, {pipeline_mode = #tpu.pipeline_mode<synchronous>, transform_indices = @transform_5, window_bounds = array<i64: 16, 16>}, {pipeline_mode = #tpu.pipeline_mode<synchronous>, transform_indices = @transform_6, window_bounds = array<i64: 16, 1>}, {pipeline_mode = #tpu.pipeline_mode<synchronous>, transform_indices = @transform_7, window_bounds = array<i64: 8, 16>}, {pipeline_mode = #tpu.pipeline_mode<synchronous>, transform_indices = @transform_8, window_bounds = array<i64: 8, 1>}, {pipeline_mode = #tpu.pipeline_mode<synchronous>, transform_indices = @transform_9, window_bounds = array<i64: 8, 1>}, {pipeline_mode = #tpu.pipeline_mode<synchronous>, transform_indices = @transform_10, window_bounds = array<i64: 8, 1>}, {transform_indices = @transform_11, window_bounds = array<i64: 1, 1>}, {transform_indices = @transform_12, window_bounds = array<i64: 1, 16>}]} {
    %0 = tpu.iota {dimensions = array<i32: 0>} : vector<32x16xi32>
    %c0 = arith.constant 0 : index
    %c0_0 = arith.constant 0 : index
    %1 = vector.load %arg1[%c0, %c0_0] : memref<1x16xi32, #tpu.memory_space<vmem>>, vector<1x16xi32>
    %2 = vector.broadcast %1 : vector<1x16xi32> to vector<32x16xi32>
    %3 = arith.cmpi eq, %0, %2 : vector<32x16xi32>
    %4 = arith.extui %3 : vector<32x16xi1> to vector<32x16xi32>
    %5 = arith.sitofp %4 : vector<32x16xi32> to vector<32x16xf32>
    %6 = tpu.iota {dimensions = array<i32: 0>} : vector<40x16xi32>
    %c0_1 = arith.constant 0 : index
    %c0_2 = arith.constant 0 : index
    %7 = vector.load %arg2[%c0_1, %c0_2] : memref<1x16xi32, #tpu.memory_space<vmem>>, vector<1x16xi32>
    %8 = vector.broadcast %7 : vector<1x16xi32> to vector<40x16xi32>
    %9 = arith.cmpi eq, %6, %8 : vector<40x16xi32>
    %10 = arith.extui %9 : vector<40x16xi1> to vector<40x16xi32>
    %11 = arith.sitofp %10 : vector<40x16xi32> to vector<40x16xf32>
    %c0_3 = arith.constant 0 : index
    %c0_4 = arith.constant 0 : index
    %12 = vector.load %arg3[%c0_3, %c0_4] : memref<24x32xf32, #tpu.memory_space<vmem>>, vector<24x32xf32>
    %cst = arith.constant dense<0.000000e+00> : vector<24x16xf32>
    %13 = tpu.matmul %12, %5, %cst {dimension_numbers = #tpu.dot_dimension_numbers<[1], [0], [0], [1], [0, 0, 1, 1], [], []>} : vector<24x32xf32>, vector<32x16xf32>, vector<24x16xf32> -> vector<24x16xf32>
    %c0_5 = arith.constant 0 : index
    %c0_6 = arith.constant 0 : index
    %14 = vector.load %arg4[%c0_5, %c0_6] : memref<24x40xf32, #tpu.memory_space<vmem>>, vector<24x40xf32>
    %cst_7 = arith.constant dense<0.000000e+00> : vector<24x16xf32>
    %15 = tpu.matmul %14, %11, %cst_7 {dimension_numbers = #tpu.dot_dimension_numbers<[1], [0], [0], [1], [0, 0, 1, 1], [], []>} : vector<24x40xf32>, vector<40x16xf32>, vector<24x16xf32> -> vector<24x16xf32>
    %16 = vector.extract_strided_slice %13 {offsets = [0, 0], sizes = [8, 16], strides = [1, 1]} : vector<24x16xf32> to vector<8x16xf32>
    %17 = vector.extract_strided_slice %13 {offsets = [8, 0], sizes = [16, 16], strides = [1, 1]} : vector<24x16xf32> to vector<16x16xf32>
    %18 = vector.extract_strided_slice %15 {offsets = [0, 0], sizes = [8, 16], strides = [1, 1]} : vector<24x16xf32> to vector<8x16xf32>
    %19 = vector.extract_strided_slice %15 {offsets = [8, 0], sizes = [16, 16], strides = [1, 1]} : vector<24x16xf32> to vector<16x16xf32>
    %20 = arith.mulf %16, %18 : vector<8x16xf32>
    %c0_8 = arith.constant 0 : index
    %c0_9 = arith.constant 0 : index
    %21 = vector.load %arg5[%c0_8, %c0_9] : memref<16x16xf32, #tpu.memory_space<vmem>>, vector<16x16xf32>
    %cst_10 = arith.constant dense<0.000000e+00> : vector<16x16xf32>
    %22 = tpu.matmul %21, %17, %cst_10 {dimension_numbers = #tpu.dot_dimension_numbers<[1], [0], [0], [1], [0, 0, 1, 1], [], []>} : vector<16x16xf32>, vector<16x16xf32>, vector<16x16xf32> -> vector<16x16xf32>
    %c0_11 = arith.constant 0 : index
    %c0_12 = arith.constant 0 : index
    %23 = vector.load %arg6[%c0_11, %c0_12] : memref<16x16xf32, #tpu.memory_space<vmem>>, vector<16x16xf32>
    %cst_13 = arith.constant dense<0.000000e+00> : vector<16x16xf32>
    %24 = tpu.matmul %23, %19, %cst_13 {dimension_numbers = #tpu.dot_dimension_numbers<[1], [0], [0], [1], [0, 0, 1, 1], [], []>} : vector<16x16xf32>, vector<16x16xf32>, vector<16x16xf32> -> vector<16x16xf32>
    %25 = arith.addf %22, %24 : vector<16x16xf32>
    %c0_14 = arith.constant 0 : index
    %c0_15 = arith.constant 0 : index
    %26 = vector.load %arg7[%c0_14, %c0_15] : memref<16x1xf32, #tpu.memory_space<vmem>>, vector<16x1xf32>
    %27 = vector.broadcast %26 : vector<16x1xf32> to vector<16x16xf32>
    %28 = arith.addf %25, %27 : vector<16x16xf32>
    %cst_16 = arith.constant 0.000000e+00 : f32
    %29 = vector.broadcast %cst_16 : f32 to vector<16x16xf32>
    %30 = arith.maximumf %28, %29 : vector<16x16xf32>
    %c0_17 = arith.constant 0 : index
    %c0_18 = arith.constant 0 : index
    %31 = vector.load %arg8[%c0_17, %c0_18] : memref<8x16xf32, #tpu.memory_space<vmem>>, vector<8x16xf32>
    %cst_19 = arith.constant dense<0.000000e+00> : vector<8x16xf32>
    %32 = tpu.matmul %31, %30, %cst_19 {dimension_numbers = #tpu.dot_dimension_numbers<[1], [0], [0], [1], [0, 0, 1, 1], [], []>} : vector<8x16xf32>, vector<16x16xf32>, vector<8x16xf32> -> vector<8x16xf32>
    %c0_20 = arith.constant 0 : index
    %c0_21 = arith.constant 0 : index
    %33 = vector.load %arg9[%c0_20, %c0_21] : memref<8x1xf32, #tpu.memory_space<vmem>>, vector<8x1xf32>
    %34 = vector.broadcast %33 : vector<8x1xf32> to vector<8x16xf32>
    %35 = arith.addf %32, %34 : vector<8x16xf32>
    %cst_22 = arith.constant 0.000000e+00 : f32
    %36 = vector.broadcast %cst_22 : f32 to vector<8x16xf32>
    %37 = arith.maximumf %35, %36 : vector<8x16xf32>
    %c0_23 = arith.constant 0 : index
    %c0_24 = arith.constant 0 : index
    %38 = vector.load %arg10[%c0_23, %c0_24] : memref<8x1xf32, #tpu.memory_space<vmem>>, vector<8x1xf32>
    %39 = vector.broadcast %38 : vector<8x1xf32> to vector<8x16xf32>
    %40 = arith.mulf %20, %39 : vector<8x16xf32>
    %c0_25 = arith.constant 0 : index
    %c0_26 = arith.constant 0 : index
    %41 = vector.load %arg11[%c0_25, %c0_26] : memref<8x1xf32, #tpu.memory_space<vmem>>, vector<8x1xf32>
    %42 = vector.broadcast %41 : vector<8x1xf32> to vector<8x16xf32>
    %43 = arith.mulf %37, %42 : vector<8x16xf32>
    %44 = arith.addf %40, %43 : vector<8x16xf32>
    %cst_27 = arith.constant dense<0.000000e+00> : vector<16xf32>
    %45 = vector.multi_reduction <add>, %44, %cst_27 [0] : vector<8x16xf32> to vector<16xf32>
    %46 = vector.shape_cast %45 : vector<16xf32> to vector<1x16xf32>
    %c0_28 = arith.constant 0 : index
    %c0_29 = arith.constant 0 : index
    %47 = memref.load %arg12[%c0_28, %c0_29] : memref<1x1xf32, #tpu.memory_space<smem>>
    %48 = vector.broadcast %47 : f32 to vector<1x16xf32>
    %49 = arith.addf %46, %48 : vector<1x16xf32>
    %c0_30 = arith.constant 0 : index
    %c0_31 = arith.constant 0 : index
    %50 = vector.load %arg13[%c0_30, %c0_31] : memref<1x16xf32, #tpu.memory_space<vmem>>, vector<1x16xf32>
    tpu.vector_store %arg13[%c0_30, %c0_31], %49 {strides = array<i32>} : memref<1x16xf32, #tpu.memory_space<vmem>>, vector<1x16xf32>,
    return
  }
  func.func @transform_0(%arg0: i32) -> (i32, i32) {
    %c0_i32 = arith.constant 0 : i32
    %c0_i32_0 = arith.constant 0 : i32
    return %c0_i32, %arg0 : i32, i32
  }
  func.func @transform_1(%arg0: i32) -> (i32, i32) {
    %c0_i32 = arith.constant 0 : i32
    %c0_i32_0 = arith.constant 0 : i32
    return %c0_i32, %arg0 : i32, i32
  }
  func.func @transform_2(%arg0: i32) -> (i32, i32) {
    %c0_i32 = arith.constant 0 : i32
    %c0_i32_0 = arith.constant 0 : i32
    %c0_i32_1 = arith.constant 0 : i32
    return %c0_i32, %c0_i32_0 : i32, i32
  }
  func.func @transform_3(%arg0: i32) -> (i32, i32) {
    %c0_i32 = arith.constant 0 : i32
    %c0_i32_0 = arith.constant 0 : i32
    %c0_i32_1 = arith.constant 0 : i32
    return %c0_i32, %c0_i32_0 : i32, i32
  }
  func.func @transform_4(%arg0: i32) -> (i32, i32) {
    %c0_i32 = arith.constant 0 : i32
    %c0_i32_0 = arith.constant 0 : i32
    %c0_i32_1 = arith.constant 0 : i32
    return %c0_i32, %c0_i32_0 : i32, i32
  }
  func.func @transform_5(%arg0: i32) -> (i32, i32) {
    %c0_i32 = arith.constant 0 : i32
    %c0_i32_0 = arith.constant 0 : i32
    %c0_i32_1 = arith.constant 0 : i32
    return %c0_i32, %c0_i32_0 : i32, i32
  }
  func.func @transform_6(%arg0: i32) -> (i32, i32) {
    %c0_i32 = arith.constant 0 : i32
    %c0_i32_0 = arith.constant 0 : i32
    %c0_i32_1 = arith.constant 0 : i32
    return %c0_i32, %c0_i32_0 : i32, i32
  }
  func.func @transform_7(%arg0: i32) -> (i32, i32) {
    %c0_i32 = arith.constant 0 : i32
    %c0_i32_0 = arith.constant 0 : i32
    %c0_i32_1 = arith.constant 0 : i32
    return %c0_i32, %c0_i32_0 : i32, i32
  }
  func.func @transform_8(%arg0: i32) -> (i32, i32) {
    %c0_i32 = arith.constant 0 : i32
    %c0_i32_0 = arith.constant 0 : i32
    %c0_i32_1 = arith.constant 0 : i32
    return %c0_i32, %c0_i32_0 : i32, i32
  }
  func.func @transform_9(%arg0: i32) -> (i32, i32) {
    %c0_i32 = arith.constant 0 : i32
    %c0_i32_0 = arith.constant 0 : i32
    %c0_i32_1 = arith.constant 0 : i32
    return %c0_i32, %c0_i32_0 : i32, i32
  }
  func.func @transform_10(%arg0: i32) -> (i32, i32) {
    %c0_i32 = arith.constant 0 : i32
    %c0_i32_0 = arith.constant 0 : i32
    %c0_i32_1 = arith.constant 0 : i32
    return %c0_i32, %c0_i32_0 : i32, i32
  }
  func.func @transform_11(%arg0: i32) -> (i32, i32) {
    %c0_i32 = arith.constant 0 : i32
    %c0_i32_0 = arith.constant 0 : i32
    %c0_i32_1 = arith.constant 0 : i32
    return %c0_i32, %c0_i32_0 : i32, i32
  }
  func.func @transform_12(%arg0: i32) -> (i32, i32) {
    %c0_i32 = arith.constant 0 : i32
    %c0_i32_0 = arith.constant 0 : i32
    return %c0_i32, %arg0 : i32, i32
  }
}

</mosaic_0001>

<bundles_post_ra>
// kernel: tpu_custom_call.1
= control target key start
LH: loop header
LB: loop body
LE: loop exit
PB: predicated region body
PF: predicated region fallthrough
CT: control target
= control target key end

     0   :  { %18 = vsyncpa [#allocation4], 0  ;;  %s961_s0 = inlined_call_operand.vmem [shape: s32[1,16], index: 0, kind: input, shape index: {}]   ;;  %s962_s1 = inlined_call_operand.vmem [shape: s32[1,16], index: 1, kind: input, shape index: {}]   ;;  %s963_s2 = inlined_call_operand.vmem [shape: f32[24,32], index: 2, kind: input, shape index: {}]   ;;  %s964_s3 = inlined_call_operand.vmem [shape: f32[24,40], index: 3, kind: input, shape index: {}]   ;;  %s965_s4 = inlined_call_operand.hbm [shape: f32[16,16], index: 4, kind: input, shape index: {}]   ;;  %s966_s5 = inlined_call_operand.vmem [shape: f32[16,16], index: 5, kind: input, shape index: {}]   ;;  %s967_s6 = inlined_call_operand.vmem [shape: f32[16,1], index: 6, kind: input, shape index: {}]   ;;  %s968_s7 = inlined_call_operand.vmem [shape: f32[8,16], index: 7, kind: input, shape index: {}]   ;;  %s969_s8 = inlined_call_operand.vmem [shape: f32[8,1], index: 8, kind: input, shape index: {}]   ;;  %s970_s9 = inlined_call_operand.vmem [shape: f32[8,1], index: 9, kind: input, shape index: {}]   ;;  %s971_s10 = inlined_call_operand.vmem [shape: f32[8,1], index: 10, kind: input, shape index: {}]   ;;  %s972_s11 = inlined_call_operand.<no memory space> [shape: f32[1,1], index: 11, kind: input, shape index: {}]   ;;  %s973_s12 = inlined_call_operand.hbm [shape: f32[1,16], index: 12, kind: output, shape index: {}]  }
   0x1   :  { %19 = vsyncpa [#allocation5], 0  ;;  %s792_s21 = smov [#allocation3]   ;;  %s744_s25 = scalar_lea.hbm %s965_s4, 256 }
   0x2   :  { %s33_s22 = sshll.u32 %s792_s21, 4  ;;  %p745_p0 = scmp.ne.s32.totalorder %s965_s4, %s744_s25  ;;  %s34_s22 = int_to_ptr.vmem [resolvable:$true] %s33_s22 }
   0x3   :  { %p748_p1 = scmp.lt.u32.totalorder %s744_s25, %s965_s4 }
   0x5   :  { %p750_p2 = pnand %p748_p1, %p745_p0 }
   0x7   :  { %753 = shalt.err (!%p750_p2)
}
   0x8   :  { %s754_s30 = scalar_lea.vmem %s34_s22, 256  ;;  %p759_p4 = scmp.lt.s32.totalorder %s34_s22, %s34_s22 }
   0x9   :  { %p755_p3 = scmp.ne.s32.totalorder %s34_s22, %s754_s30  ;;  %p760_p5 = scmp.lt.s32.totalorder %s754_s30, %s754_s30 }
   0xb   :  { %p761_p6 = por %p760_p5, %p759_p4 }
   0xd   :  { %p762_p7 = pnand %p761_p6, %p755_p3 }
   0xf   :  { %765 = shalt.err (!%p762_p7)
}
  0x10   :  { %s793_s13 = smov 128   ;;  %s794_s14 = smov 8  }
  0x11   :  { %39 = dma.hbm_to_vmem [thread:$0]  %s965_s4, 256, %s34_s22, [#allocation4], %s793_s13, %s793_s13, %s794_s14  }
  0x12   :  { %788 = dma.done.wait [#allocation4], 256  }
  0x13   :  { %789 = vsyncadd [#allocation4], 4294967040  ;;  %v57_v0 = vlaneseq  ;;  %v795_v1 = vmov 0.0|0.0   ;;  %vm796_vm0 = vmmov 0   ;;  %v797_v3 = vmov 0.0   ;;  %v471_v11 = vld [vmem:[%s969_s8] sm:$0xff] }
  0x14   :  { %713 = vmatprep.subr.bf16.mxu1 %v795_v1  ;;  %707 = vmatprep.subr.bf16.mxu0 %v795_v1  ;;  %v798_v4 = vmov 0   ;;  %v598_v8 = vld [vmem:[%s962_s1] ss:$0 sm:$0xff]  ;;  %v799_v10 = vmov 1.0|1.0   ;;  %vm103_vm14 = vcmask 261120  }
  0x15   :  { %v58_v2 = vshrl.u32 %v57_v0, 7  ;;  %658 = vmatprep.mubr.msk.f32.mxu0 %vm796_vm0, %v797_v3  ;;  %677 = vmatprep.mubr.msk.f32.mxu1 %vm796_vm0, %v797_v3  ;;  %v593_v9 = vld [vmem:[%s961_s0] ss:$0 sm:$0xff]  ;;  %vm196_vm15 = vcmask 326656   ;;  %v800_v16 = vmov 1.0   ;;  %v101_v17 = vld [vmem:[%s963_s2 + $0x8] sm:$0xff] }
  0x16   :  { %743 = vset.pattern.permute.xlu1 %v798_v4  ;;  %742 = vset.pattern.permute.xlu0 %v798_v4  ;;  %v551_v13 = vld [vmem:[%s970_s9] sm:$0xff]  ;;  %v194_v18 = vld [vmem:[%s964_s3 + $0x8] sm:$0xff]  ;;  %v102_v19 = vld [vmem:[%s963_s2 + $0x10] sm:$0xff]  ;;  %s801_s21 = smov [#allocation6]  }
  0x17   :  { %v59_v5 = vadd.s32 8, %v58_v2  ;;  %v60_v6 = vadd.s32 16, %v58_v2  ;;  %v61_v7 = vadd.s32 24, %v58_v2  ;;  %vm85_vm1 = vcmp.eq.s32.totalorder %v58_v2, %v598_v8  ;;  %474 = vperm.xlu1 %743, %v471_v11   ;;  %v100_v14 = vld [vmem:[%s963_s2] sm:$0xff]  ;;  %v195_v20 = vld [vmem:[%s964_s3 + $0x10] sm:$0xff]  ;;  %v455_v23 = vld [vmem:[%s967_s6 + $0x8] sm:$0xff] }
  0x18   :  { %vm67_vm3 = vcmp.eq.s32.totalorder %v58_v2, %v593_v9  ;;  %v79_v12 = vadd.s32 32, %v58_v2  ;;  %v193_v15 = vld [vmem:[%s964_s3] sm:$0xff]  ;;  %v290_v40 = vld [vmem:[%s966_s5 + $0x8] sm:$0xff]  ;;  %s584_s0 = sshll.u32 %s801_s21, 4  ;;  %s585_s0 = int_to_ptr.vmem [resolvable:$true] %s584_s0 }
  0x19   :  { %vm86_vm2 = vcmp.eq.s32.totalorder %v59_v5, %v598_v8  ;;  %vm68_vm4 = vcmp.eq.s32.totalorder %v59_v5, %v593_v9  ;;  %vm87_vm6 = vcmp.eq.s32.totalorder %v60_v6, %v598_v8  ;;  %vm88_vm7 = vcmp.eq.s32.totalorder %v61_v7, %v598_v8  ;;  %v289_v21 = vld [vmem:[%s966_s5] sm:$0xff]  ;;  %v288_v42 = vld [vmem:[#allocation3 + $0x8] sm:$0xff]  ;;  %s766_s1 = scalar_lea.vmem %s585_s0, 16  ;;  %s770_s22 = scalar_lea.vmem %s585_s0, 32 }
  0x1a   :  { %vm714_vm5 = vmpackc.low %vm86_vm2, %vm85_vm1  ;;  %vm69_vm8 = vcmp.eq.s32.totalorder %v60_v6, %v593_v9  ;;  %vm70_vm9 = vcmp.eq.s32.totalorder %v61_v7, %v593_v9  ;;  %vm89_vm13 = vcmp.eq.s32.totalorder %v79_v12, %v598_v8  ;;  %vm291_vm1 = vcmask 130048   ;;  %v454_v22 = vld [vmem:[%s967_s6] sm:$0xff]  ;;  %p767_p8 = scmp.ne.s32.totalorder %s585_s0, %s766_s1  ;;  %p771_p9 = scmp.lt.s32.totalorder %s585_s0, %s585_s0 }
  0x1b   :  { %715 = vmatpush3.bf16.msk.msra.mxu1 %vm714_vm5, %v799_v10  ;;  %vm708_vm10 = vmpackc.low %vm68_vm4, %vm67_vm3  ;;  %554 = vperm.xlu1 %743, %v551_v13   ;;  %v558_v24 = vld [vmem:[%s971_s10] sm:$0xff]  ;;  %v574_v5 = vstv %s972_s11  ;;  %p772_p10 = scmp.lt.s32.totalorder %s770_s22, %s766_s1 }
  0x1c   :  { %709 = vmatpush3.bf16.msk.msra.mxu0 %vm708_vm10, %v799_v10  ;;  %716 = vmatprep.subr.bf16.mxu1 %v795_v1  ;;  %vm717_vm11 = vmpackc.low %vm88_vm7, %vm87_vm6  ;;  %v287_v41 = vld [vmem:[#allocation3] sm:$0xff] }
  0x1d   :  { %710 = vmatprep.subr.bf16.mxu0 %v795_v1  ;;  %vm711_vm12 = vmpackc.low %vm70_vm9, %vm69_vm8  ;;  %458 = vperm.xlu0 %742, %v454_v22   ;;  %v470_v52 = vld [vmem:[%s968_s7] sm:$0xff]  ;;  %p773_p11 = por %p772_p10, %p771_p9 }
  0x1f   :  { %718 = vmatpush3.bf16.msk.msra.mxu1 %vm717_vm11, %v799_v10  ;;  %p774_p12 = pnand %p773_p11, %p767_p8 }
  0x20   :  { %712 = vmatpush3.bf16.msk.msra.mxu0 %vm711_vm12, %v799_v10  ;;  %675 = vmatprep.subr.mxu1 %v797_v3 }
  0x21   :  { %463 = vperm.xlu0 %742, %v455_v23  }
  0x23   :  { %676 = vmatpush3.msk.msra.mxu1 %vm89_vm13, %v800_v16  ;;  %659 = vmatmul.mubr.msk.f32.vlgmr.msra.gmra.mrb[0].mxu0 %vm103_vm14, %v100_v14 }
  0x24   :  { %678 = vmatmul.mubr.msk.f32.vlgmr.msra.gmra.mrb[0].mxu1 %vm196_vm15, %v193_v15  ;;  %661 = vmatprep.mubr.msk.f32.mxu0 %vm796_vm0, %v797_v3 }
  0x25   :  { %680 = vmatprep.mubr.msk.f32.mxu1 %vm796_vm0, %v797_v3  ;;  %727 = vmatprep.subr.bf16.mxu1 %v795_v1 }
  0x26   :  { %561 = vperm.xlu0 %742, %v558_v24  }
  0x27   :  { %662 = vmatmul.mubr.msk.f32.gmra.mrb[2].mxu0 %vm103_vm14, %v101_v17 }
  0x28   :  { %681 = vmatmul.mubr.msk.f32.gmra.mrb[2].mxu1 %vm196_vm15, %v194_v18  ;;  %664 = vmatprep.mubr.msk.f32.mxu0 %vm796_vm0, %v797_v3 }
  0x29   :  { %683 = vmatprep.mubr.msk.f32.mxu1 %vm796_vm0, %v797_v3 }
  0x2b   :  { %665 = vmatmul.mubr.msk.f32.gmra.mrb[4].mxu0 %vm103_vm14, %v102_v19 }
  0x2c   :  { %684 = vmatmul.mubr.msk.f32.gmra.mrb[4].mxu1 %vm196_vm15, %v195_v20  ;;  %690 = vmatprep.mubr.msk.f32.mxu0 %vm291_vm1, %v289_v21 }
  0x2d   :  { %704 = vmatprep.mubr.msk.f32.mxu1 %vm796_vm0, %v797_v3  ;;  %vm576_vm0 = vcmask 122880  }
  0x96   :  { %v475_v53 = vpop.permute.xlu1 %474 }
  0x9a   :  { %v555_v57 = vpop.permute.xlu1 %554 }
  0x9c   :  { %v459_v43 = vpop.permute.xlu0 %458 }
  0xa0   :  { %v464_v44 = vpop.permute.xlu0 %463 }
  0xa5   :  { %v562_v59 = vpop.permute.xlu0 %561 }
  0xf6   :  { %v179_v25 = vpop.f32.mrb[0].mxu0 }
  0xf7   :  { %v272_v26 = vpop.f32.mrb[0].mxu1  ;;  %v660_v27 = vpop.f32.mrb[1].mxu0 }
  0xf8   :  { %v286_v28 = vmul.f32 %v272_v26, %v179_v25  ;;  %v679_v29 = vpop.f32.mrb[1].mxu1 }
  0xfa   :  { %v184_v30 = vpop.f32.mrb[2].mxu0  ;;  %v557_v60 = vmul.f32 %v555_v57, %v286_v28 }
  0xfb   :  { %v277_v31 = vpop.f32.mrb[2].mxu1  ;;  %v663_v32 = vpop.f32.mrb[3].mxu0 }
  0xfc   :  { %v682_v33 = vpop.f32.mrb[3].mxu1 }
  0xfe   :  { %v189_v34 = vpop.f32.mrb[4].mxu0 }
  0xff   :  { %v282_v35 = vpop.f32.mrb[4].mxu1  ;;  %v723_v36 = vpack.c.bf16 %v189_v34, %v184_v30  ;;  %v666_v37 = vpop.f32.mrb[5].mxu0 }
 0x100   :  { %v719_v38 = vpack.c.bf16 %v282_v35, %v277_v31  ;;  %v685_v39 = vpop.f32.mrb[5].mxu1 }
 0x102   :  { %720 = vmatprep.subr.bf16.mxu0 %v719_v38 }
 0x103   :  { %722 = vmatpush3.bf16.msra.mxu0 %v719_v38 }
 0x104   :  { %724 = vmatprep.subr.bf16.mxu0 %v723_v36 }
 0x106   :  { %691 = vmatmul.mubr.msk.f32.vlgmr.msra.gmra.mrb[6].mxu0 %vm291_vm1, %v290_v40 }
 0x107   :  { %726 = vmatpush3.bf16.msra.mxu0 %v723_v36  ;;  %697 = vmatprep.mubr.msk.f32.mxu0 %vm291_vm1, %v287_v41 }
 0x10e   :  { %698 = vmatmul.mubr.msk.f32.vlgmr.msra.gmra.mrb[6].mxu0 %vm291_vm1, %v288_v42 }
 0x1e1   :  { %v699_v45 = vpop.f32.mrb[6].mxu0 }
 0x1e2   :  { %v467_v46 = vadd.f32 %v699_v45, %v464_v44  ;;  %v445_v47 = vpop.f32.mrb[7].mxu0 }
 0x1e3   :  { %v466_v48 = vadd.f32 %v459_v43, %v445_v47 }
 0x1e4   :  { %v469_v49 = vmax.f32 %v467_v46, 0.0 }
 0x1e5   :  { %v468_v50 = vmax.f32 %v466_v48, 0.0 }
 0x1e7   :  { %v728_v51 = vpack.c.bf16 %v469_v49, %v468_v50 }
 0x1e9   :  { %729 = vmatpush3.bf16.msra.mxu1 %v728_v51 }
 0x1ec   :  { %705 = vmatmul.mubr.msk.f32.vlgmr.msra.gmra.mrb[6].mxu1 %vm291_vm1, %v470_v52 }
 0x2bf   :  { %v546_v54 = vpop.f32.mrb[6].mxu1 }
 0x2c0   :  { %v547_v55 = vadd.f32 %v546_v54, %v475_v53  ;;  %v706_v56 = vpop.f32.mrb[7].mxu1 }
 0x2c2   :  { %v550_v58 = vmax.f32 %v547_v55, 0.0 }
 0x2c4   :  { %v564_v61 = vmul.f32 %v562_v59, %v550_v58 }
 0x2c6   :  { %v565_v62 = vadd.f32 %v564_v61, %v557_v60 }
 0x2c8   :  { %v566_v63 = vsel %vm291_vm1, %v565_v62, 0.0 }
 0x2c9   :  { %v567_v0 = vrot.slane %v566_v63, 4 }
 0x2cb   :  { %v568_v1 = vadd.f32 %v567_v0, %v566_v63 }
 0x2cd   :  { %v569_v2 = vrot.slane %v568_v1, 2 }
 0x2cf   :  { %v570_v3 = vadd.f32 %v569_v2, %v568_v1 }
 0x2d1   :  { %v571_v4 = vrot.slane %v570_v3, 1 }
 0x2d3   :  { %v572_v6 = vadd.f32 %v571_v4, %v570_v3 }
 0x2d5   :  { %v575_v7 = vadd.f32 %v574_v5, %v572_v6 }
 0x2d7   :  { %577 = vst.msk [vmem:[#allocation6] sm:$0x1] %vm576_vm0, %v575_v7 }
 0x2d8   :  { %777 = shalt.err (!%p774_p12)
}
 0x2d9   :  { %s778_s24 = scalar_lea.hbm %s973_s12, 16 }
 0x2da   :  { %p779_p13 = scmp.ne.s32.totalorder %s973_s12, %s778_s24  ;;  %p782_p0 = scmp.lt.u32.totalorder %s778_s24, %s973_s12 }
 0x2dc   :  { %p784_p1 = pnand %p782_p0, %p779_p13 }
 0x2de   :  { %787 = shalt.err (!%p784_p1)
}
 0x2df   :  { %587 = dma.vmem_to_hbm [thread:$0]  %s585_s0, 16, %s973_s12, [#allocation5]  }
 0x2e0   :  { %790 = dma.done.wait [#allocation5], 16  }
 0x2e1   :  { %791 = vsyncadd [#allocation5], 4294967280 }
 0x2e2   :  { %591 = vsyncpa [#allocation4], 1 }
 0x2e3   :  { %592 = vsyncpa [#allocation5], 1 }

</bundles_post_ra>
